<compile_context>
chip_gen: v7x
topology: tpu7x:2x2x1
jax: 0.10.0
libtpu: 0.0.40
codegen_flags: <defaults>
</compile_context>

<pallas_src>
import numpy as np

import jax
import jax.numpy as jnp
from jax.experimental import pallas as pl
from jax.experimental.pallas import tpu as pltpu


# -----------------------------------------------------------------------------
# Pallas kernel: mutation-context encoder + masked set-sum.
# Row = element (mutation), lane = feature, throughout:
#   x block : (Nb, C*W)      flattened NCW input
#   h1      : (Nb, W1*F)     time-major / channel-minor
#   h2      : (Nb, W2*F)
#   emb     : (Nb, latent)
#   out     : (Bb, latent)   masked set embeddings
# -----------------------------------------------------------------------------
def mufacnet_encoder_kernel(x_ref, mask_ref,
                            a1_ref, b1_ref,      # conv1 folded Toeplitz weight / bias
                            a2_ref, b2_ref,      # conv2 folded Toeplitz weight / bias
                            w3_ref, b3_ref,      # encoder Linear 1
                            w4_ref, b4_ref,      # encoder Linear 2
                            out_ref):
    nb = x_ref.shape[0]                 # rows in this block = Bb * M
    bb = out_ref.shape[0]               # sets per block
    m = nb // bb                        # mutations per set
    f = w3_ref.shape[0]                 # num_filters
    w2_len = a2_ref.shape[1] // f       # conv2 output length

    # ---- Conv1d #1 (valid) + ReLU: one bf16 MXU matmul, f32 accumulate.
    xb = x_ref[...].astype(jnp.bfloat16)
    h1 = jnp.dot(xb, a1_ref[...], preferred_element_type=jnp.float32)
    h1 = jnp.maximum(h1 + b1_ref[...], 0.0)

    # ---- Conv1d #2 (valid) + ReLU.
    h2 = jnp.dot(h1.astype(jnp.bfloat16), a2_ref[...],
                 preferred_element_type=jnp.float32)
    h2 = jnp.maximum(h2 + b2_ref[...], 0.0)

    # ---- AdaptiveMaxPool1d(1) + Flatten: max over time via static lane slices,
    # reduced as a log-depth tree (no reshape of the big activation).
    parts = [h2[:, s * f:(s + 1) * f] for s in range(w2_len)]
    while len(parts) > 1:
        nxt = []
        for i in range(0, len(parts) - 1, 2):
            nxt.append(jnp.maximum(parts[i], parts[i + 1]))
        if len(parts) % 2:
            nxt.append(parts[-1])
        parts = nxt
    pooled = parts[0]                                            # (Nb, F)

    # ---- Encoder MLP -> element embeddings (Nb, latent).
    e = jnp.dot(pooled.astype(jnp.bfloat16), w3_ref[...],
                preferred_element_type=jnp.float32) + b3_ref[...]
    e = jnp.maximum(e, 0.0)
    emb = jnp.dot(e.astype(jnp.bfloat16), w4_ref[...],
                  preferred_element_type=jnp.float32) + b4_ref[...]

    # ---- Masked sum over the mutation axis:
    #   masked[n, :] = emb[n, :] * mask[n]        (one VPU multiply)
    #   set_emb      = S @ masked                 (one MXU contraction)
    # where S is the constant block-diagonal selector S[b, n] = (n // M == b),
    # built from two iotas (no per-mutation unrolled loop).
    masked = emb * mask_ref[...]                                  # (Nb, latent)
    row = jax.lax.broadcasted_iota(jnp.int32, (bb, nb), 0)
    col = jax.lax.broadcasted_iota(jnp.int32, (bb, nb), 1)
    sel = jnp.where((col >= row * m) & (col < (row + 1) * m), 1.0, 0.0)
    out_ref[...] = jnp.dot(sel, masked,
                           preferred_element_type=jnp.float32).astype(out_ref.dtype)


# -----------------------------------------------------------------------------
# Host-side weight packing: fold each valid Conv1d into one (in, out) Toeplitz
# matmul matrix (done once, at parameter-prep time).
# -----------------------------------------------------------------------------
def _pack_encoder_weights(params, context_width):
    w1 = np.asarray(params["conv1_w"], np.float32)   # (F, C, K)  torch layout
    w2 = np.asarray(params["conv2_w"], np.float32)   # (F, F, K)
    b1 = np.asarray(params["conv1_b"], np.float32)
    b2 = np.asarray(params["conv2_b"], np.float32)
    f, c, k = w1.shape
    w = context_width
    w1_len = w - k + 1
    w2_len = w1_len - k + 1

    # A1[c*W + u, t*F + g] = w1[g, c, u - t]  for 0 <= u - t < K
    a1 = np.zeros((c, w, w1_len, f), np.float32)
    w1_ckf = np.transpose(w1, (1, 2, 0))             # (C, K, F)
    for t in range(w1_len):
        a1[:, t:t + k, t, :] = w1_ckf

    # A2[u*F + fi, s*F + g] = w2[g, fi, u - s]  for 0 <= u - s < K
    a2 = np.zeros((w1_len, f, w2_len, f), np.float32)
    w2_kif = np.transpose(w2, (2, 1, 0))             # (K, F_in, F_out)
    for s in range(w2_len):
        a2[s:s + k, :, s, :] = w2_kif

    return {
        "a1": jnp.asarray(a1.reshape(c * w, w1_len * f), jnp.bfloat16),
        "b1": jnp.asarray(np.tile(b1, w1_len)[None, :], jnp.float32),
        "a2": jnp.asarray(a2.reshape(w1_len * f, w2_len * f), jnp.bfloat16),
        "b2": jnp.asarray(np.tile(b2, w2_len)[None, :], jnp.float32),
        "w3": jnp.asarray(params["fc1_w"]).T.astype(jnp.bfloat16),   # (F, hidden)
        "b3": jnp.asarray(params["fc1_b"])[None, :].astype(jnp.float32),
        "w4": jnp.asarray(params["fc2_w"]).T.astype(jnp.bfloat16),   # (hidden, latent)
        "b4": jnp.asarray(params["fc2_b"])[None, :].astype(jnp.float32),
    }


def init_params(key, input_dim, latent_dim=32, num_filters=32, hidden_dim=128,
                kernel_size=5):
    """Parameters stored in PyTorch layout: conv (out,in,K), linear (out,in), bias (out,)."""
    ks = jax.random.split(key, 14)
    s = 0.1
    n = jax.random.normal
    return {
        "conv1_w": n(ks[0], (num_filters, input_dim, kernel_size), jnp.float32) * s,
        "conv1_b": n(ks[1], (num_filters,), jnp.float32) * s,
        "conv2_w": n(ks[2], (num_filters, num_filters, kernel_size), jnp.float32) * s,
        "conv2_b": n(ks[3], (num_filters,), jnp.float32) * s,
        "fc1_w": n(ks[4], (hidden_dim, num_filters), jnp.float32) * s,
        "fc1_b": n(ks[5], (hidden_dim,), jnp.float32) * s,
        "fc2_w": n(ks[6], (latent_dim, hidden_dim), jnp.float32) * s,
        "fc2_b": n(ks[7], (latent_dim,), jnp.float32) * s,
        "dec1_w": n(ks[8], (hidden_dim, latent_dim), jnp.float32) * s,
        "dec1_b": n(ks[9], (hidden_dim,), jnp.float32) * s,
        "dec2_w": n(ks[10], (hidden_dim, hidden_dim), jnp.float32) * s,
        "dec2_b": n(ks[11], (hidden_dim,), jnp.float32) * s,
        "dec3_w": n(ks[12], (1, hidden_dim), jnp.float32) * s,
        "dec3_b": n(ks[13], (1,), jnp.float32) * s,
    }


# -----------------------------------------------------------------------------
# Forward: gridded Pallas encoder + tiny decoder in plain XLA.
# -----------------------------------------------------------------------------
def mufacnet_forward(mutation_sets, mutation_sets_mask, params, *, rows_per_block=1024):
    """mutation_sets: (B, M, input_dim, W) f32; mask: (B, M) f32 -> (B, 1) f32."""
    B, M, C, W = mutation_sets.shape
    latent = params["fc2_w"].shape[0]

    enc = _pack_encoder_weights(params, W)

    # Block = whole mutation sets (Bb sets -> Bb*M rows), ~rows_per_block rows per block
    # (bigger blocks amortize the ~0.35us per-grid-step overhead).
    bb = max(1, rows_per_block // M)
    if bb >= B:
        bb = B                               # single block: block dims == full dims
    else:
        bb = max(8, (bb // 8) * 8)           # multi-block: keep second-to-last dims 8-aligned
    bp = pl.cdiv(B, bb) * bb
    grid = (bp // bb,)
    nb = bb * M

    x_flat = mutation_sets.reshape(B * M, C * W)          # NCW flatten, no wrapper transpose
    mask = mutation_sets_mask.astype(jnp.float32).reshape(B * M, 1)
    if bp != B:                                           # zero-pad ragged last block
        x_flat = jnp.pad(x_flat, ((0, (bp - B) * M), (0, 0)))
        mask = jnp.pad(mask, ((0, (bp - B) * M), (0, 0)))

    def resident(arr):                                    # weights stay resident in VMEM
        return pl.BlockSpec(arr.shape, lambda i: (0,) * arr.ndim)

    set_emb = pl.pallas_call(
        mufacnet_encoder_kernel,
        out_shape=jax.ShapeDtypeStruct((bp, latent), jnp.float32),
        grid=grid,
        in_specs=[
            pl.BlockSpec((nb, C * W), lambda i: (i, 0)),     # x block
            pl.BlockSpec((nb, 1), lambda i: (i, 0)),         # per-row mask block
            resident(enc["a1"]), resident(enc["b1"]),
            resident(enc["a2"]), resident(enc["b2"]),
            resident(enc["w3"]), resident(enc["b3"]),
            resident(enc["w4"]), resident(enc["b4"]),
        ],
        out_specs=pl.BlockSpec((bb, latent), lambda i: (i, 0)),
        compiler_params=pltpu.CompilerParams(
            dimension_semantics=("parallel",),
            vmem_limit_bytes=32 * 1024 * 1024),
    )(x_flat, mask,
      enc["a1"], enc["b1"], enc["a2"], enc["b2"],
      enc["w3"], enc["b3"], enc["w4"], enc["b4"])

    set_emb = set_emb[:B]

    # Tiny joint-effect decoder (B rows only) in plain XLA.
    d = jax.nn.relu(set_emb @ params["dec1_w"].T + params["dec1_b"])
    d = jax.nn.relu(d @ params["dec2_w"].T + params["dec2_b"])
    return d @ params["dec3_w"].T + params["dec3_b"]


# -----------------------------------------------------------------------------
# Pure-JAX f32 reference (matches the PyTorch module exactly).
# -----------------------------------------------------------------------------
def mufacnet_reference(mutation_sets, mutation_sets_mask, params):
    B, M, C, W = mutation_sets.shape
    K = params["conv1_w"].shape[2]
    W1, W2 = W - K + 1, W - 2 * (K - 1)
    x = mutation_sets.reshape(B * M, C, W).transpose(0, 2, 1)     # (N, W, C)
    w1 = jnp.transpose(params["conv1_w"], (2, 1, 0))              # (K, C, F)
    w2 = jnp.transpose(params["conv2_w"], (2, 1, 0))              # (K, F, F)
    h1 = sum(jnp.einsum("nwc,cf->nwf", x[:, k:k + W1, :], w1[k]) for k in range(K))
    h1 = jax.nn.relu(h1 + params["conv1_b"])
    h2 = sum(jnp.einsum("nwf,fg->nwg", h1[:, k:k + W2, :], w2[k]) for k in range(K))
    h2 = jax.nn.relu(h2 + params["conv2_b"])
    pooled = jnp.max(h2, axis=1)
    e = jax.nn.relu(pooled @ params["fc1_w"].T + params["fc1_b"])
    emb = (e @ params["fc2_w"].T + params["fc2_b"]).reshape(B, M, -1)
    set_emb = jnp.sum(emb * mutation_sets_mask[:, :, None], axis=1)
    d = jax.nn.relu(set_emb @ params["dec1_w"].T + params["dec1_b"])
    d = jax.nn.relu(d @ params["dec2_w"].T + params["dec2_b"])
    return d @ params["dec3_w"].T + params["dec3_b"]


if __name__ == "__main__":
    # Small shapes consistent with the module's forward:
    #   batch=2, max_mutation_num=4, input_dim=4, context_width=16
    B, M, INPUT_DIM, W = 2, 4, 4, 16
    LATENT, FILTERS, HIDDEN, KSIZE = 32, 32, 128, 5

    key = jax.random.PRNGKey(0)
    k_x, k_m, k_p = jax.random.split(key, 3)
    mutation_sets = jax.random.normal(k_x, (B, M, INPUT_DIM, W), jnp.float32)
    mutation_sets_mask = jax.random.bernoulli(k_m, 0.7, (B, M)).astype(jnp.float32)
    params = init_params(k_p, INPUT_DIM, LATENT, FILTERS, HIDDEN, KSIZE)

    out = mufacnet_forward(mutation_sets, mutation_sets_mask, params)
    out = jax.block_until_ready(out)

    ref = jax.block_until_ready(mufacnet_reference(mutation_sets, mutation_sets_mask, params))
    assert out.shape == (B, 1), out.shape
    assert jnp.allclose(out, ref, atol=2e-2, rtol=2e-2), (out, ref)

    print("KERNEL_OK")
</pallas_src>

<mosaic_0001>
module attributes {stable_mosaic.version = 11 : i64} {
  func.func @mufacnet_encoder_kernel(%arg0: i32, %arg1: memref<8x64xf32, #tpu.memory_space<vmem>>, %arg2: memref<8x1xf32, #tpu.memory_space<vmem>>, %arg3: memref<64x384xbf16, #tpu.memory_space<vmem>>, %arg4: memref<1x384xf32, #tpu.memory_space<vmem>>, %arg5: memref<384x256xbf16, #tpu.memory_space<vmem>>, %arg6: memref<1x256xf32, #tpu.memory_space<vmem>>, %arg7: memref<32x128xbf16, #tpu.memory_space<vmem>>, %arg8: memref<1x128xf32, #tpu.memory_space<vmem>>, %arg9: memref<128x32xbf16, #tpu.memory_space<vmem>>, %arg10: memref<1x32xf32, #tpu.memory_space<vmem>>, %arg11: memref<2x32xf32, #tpu.memory_space<vmem>>) attributes {dimension_semantics = [#tpu.dimension_semantics<parallel>], iteration_bounds = array<i64: 1>, scalar_prefetch = 0 : i64, scratch_operands = 0 : i64, tpu.core_type = #tpu.core_type<tc>, window_params = [{transform_indices = @transform_0, window_bounds = array<i64: 8, 64>}, {transform_indices = @transform_1, window_bounds = array<i64: 8, 1>}, {pipeline_mode = #tpu.pipeline_mode<synchronous>, transform_indices = @transform_2, window_bounds = array<i64: 64, 384>}, {pipeline_mode = #tpu.pipeline_mode<synchronous>, transform_indices = @transform_3, window_bounds = array<i64: 1, 384>}, {pipeline_mode = #tpu.pipeline_mode<synchronous>, transform_indices = @transform_4, window_bounds = array<i64: 384, 256>}, {pipeline_mode = #tpu.pipeline_mode<synchronous>, transform_indices = @transform_5, window_bounds = array<i64: 1, 256>}, {pipeline_mode = #tpu.pipeline_mode<synchronous>, transform_indices = @transform_6, window_bounds = array<i64: 32, 128>}, {pipeline_mode = #tpu.pipeline_mode<synchronous>, transform_indices = @transform_7, window_bounds = array<i64: 1, 128>}, {pipeline_mode = #tpu.pipeline_mode<synchronous>, transform_indices = @transform_8, window_bounds = array<i64: 128, 32>}, {pipeline_mode = #tpu.pipeline_mode<synchronous>, transform_indices = @transform_9, window_bounds = array<i64: 1, 32>}, {transform_indices = @transform_10, window_bounds = array<i64: 2, 32>}]} {
    %c0 = arith.constant 0 : index
    %c0_0 = arith.constant 0 : index
    %0 = vector.load %arg1[%c0, %c0_0] : memref<8x64xf32, #tpu.memory_space<vmem>>, vector<8x64xf32>
    %1 = arith.truncf %0 : vector<8x64xf32> to vector<8x64xbf16>
    %c0_1 = arith.constant 0 : index
    %c0_2 = arith.constant 0 : index
    %2 = vector.load %arg3[%c0_1, %c0_2] : memref<64x384xbf16, #tpu.memory_space<vmem>>, vector<64x384xbf16>
    %cst = arith.constant dense<0.000000e+00> : vector<8x384xf32>
    %3 = tpu.matmul %1, %2, %cst {dimension_numbers = #tpu.dot_dimension_numbers<[1], [0], [0], [1], [0, 0, 1, 1], [], []>} : vector<8x64xbf16>, vector<64x384xbf16>, vector<8x384xf32> -> vector<8x384xf32>
    %c0_3 = arith.constant 0 : index
    %c0_4 = arith.constant 0 : index
    %4 = vector.load %arg4[%c0_3, %c0_4] : memref<1x384xf32, #tpu.memory_space<vmem>>, vector<1x384xf32>
    %5 = vector.broadcast %4 : vector<1x384xf32> to vector<8x384xf32>
    %6 = arith.addf %3, %5 : vector<8x384xf32>
    %cst_5 = arith.constant 0.000000e+00 : f32
    %7 = vector.broadcast %cst_5 : f32 to vector<8x384xf32>
    %8 = arith.maximumf %6, %7 : vector<8x384xf32>
    %9 = arith.truncf %8 : vector<8x384xf32> to vector<8x384xbf16>
    %c0_6 = arith.constant 0 : index
    %c0_7 = arith.constant 0 : index
    %10 = vector.load %arg5[%c0_6, %c0_7] : memref<384x256xbf16, #tpu.memory_space<vmem>>, vector<384x256xbf16>
    %cst_8 = arith.constant dense<0.000000e+00> : vector<8x256xf32>
    %11 = tpu.matmul %9, %10, %cst_8 {dimension_numbers = #tpu.dot_dimension_numbers<[1], [0], [0], [1], [0, 0, 1, 1], [], []>} : vector<8x384xbf16>, vector<384x256xbf16>, vector<8x256xf32> -> vector<8x256xf32>
    %c0_9 = arith.constant 0 : index
    %c0_10 = arith.constant 0 : index
    %12 = vector.load %arg6[%c0_9, %c0_10] : memref<1x256xf32, #tpu.memory_space<vmem>>, vector<1x256xf32>
    %13 = vector.broadcast %12 : vector<1x256xf32> to vector<8x256xf32>
    %14 = arith.addf %11, %13 : vector<8x256xf32>
    %cst_11 = arith.constant 0.000000e+00 : f32
    %15 = vector.broadcast %cst_11 : f32 to vector<8x256xf32>
    %16 = arith.maximumf %14, %15 : vector<8x256xf32>
    %17 = vector.extract_strided_slice %16 {offsets = [0, 0], sizes = [8, 32], strides = [1, 1]} : vector<8x256xf32> to vector<8x32xf32>
    %18 = vector.extract_strided_slice %16 {offsets = [0, 32], sizes = [8, 32], strides = [1, 1]} : vector<8x256xf32> to vector<8x32xf32>
    %19 = vector.extract_strided_slice %16 {offsets = [0, 64], sizes = [8, 32], strides = [1, 1]} : vector<8x256xf32> to vector<8x32xf32>
    %20 = vector.extract_strided_slice %16 {offsets = [0, 96], sizes = [8, 32], strides = [1, 1]} : vector<8x256xf32> to vector<8x32xf32>
    %21 = vector.extract_strided_slice %16 {offsets = [0, 128], sizes = [8, 32], strides = [1, 1]} : vector<8x256xf32> to vector<8x32xf32>
    %22 = vector.extract_strided_slice %16 {offsets = [0, 160], sizes = [8, 32], strides = [1, 1]} : vector<8x256xf32> to vector<8x32xf32>
    %23 = vector.extract_strided_slice %16 {offsets = [0, 192], sizes = [8, 32], strides = [1, 1]} : vector<8x256xf32> to vector<8x32xf32>
    %24 = vector.extract_strided_slice %16 {offsets = [0, 224], sizes = [8, 32], strides = [1, 1]} : vector<8x256xf32> to vector<8x32xf32>
    %25 = arith.maximumf %17, %18 : vector<8x32xf32>
    %26 = arith.maximumf %19, %20 : vector<8x32xf32>
    %27 = arith.maximumf %21, %22 : vector<8x32xf32>
    %28 = arith.maximumf %23, %24 : vector<8x32xf32>
    %29 = arith.maximumf %25, %26 : vector<8x32xf32>
    %30 = arith.maximumf %27, %28 : vector<8x32xf32>
    %31 = arith.maximumf %29, %30 : vector<8x32xf32>
    %32 = arith.truncf %31 : vector<8x32xf32> to vector<8x32xbf16>
    %c0_12 = arith.constant 0 : index
    %c0_13 = arith.constant 0 : index
    %33 = vector.load %arg7[%c0_12, %c0_13] : memref<32x128xbf16, #tpu.memory_space<vmem>>, vector<32x128xbf16>
    %cst_14 = arith.constant dense<0.000000e+00> : vector<8x128xf32>
    %34 = tpu.matmul %32, %33, %cst_14 {dimension_numbers = #tpu.dot_dimension_numbers<[1], [0], [0], [1], [0, 0, 1, 1], [], []>} : vector<8x32xbf16>, vector<32x128xbf16>, vector<8x128xf32> -> vector<8x128xf32>
    %c0_15 = arith.constant 0 : index
    %c0_16 = arith.constant 0 : index
    %35 = vector.load %arg8[%c0_15, %c0_16] : memref<1x128xf32, #tpu.memory_space<vmem>>, vector<1x128xf32>
    %36 = vector.broadcast %35 : vector<1x128xf32> to vector<8x128xf32>
    %37 = arith.addf %34, %36 : vector<8x128xf32>
    %cst_17 = arith.constant 0.000000e+00 : f32
    %38 = vector.broadcast %cst_17 : f32 to vector<8x128xf32>
    %39 = arith.maximumf %37, %38 : vector<8x128xf32>
    %40 = arith.truncf %39 : vector<8x128xf32> to vector<8x128xbf16>
    %c0_18 = arith.constant 0 : index
    %c0_19 = arith.constant 0 : index
    %41 = vector.load %arg9[%c0_18, %c0_19] : memref<128x32xbf16, #tpu.memory_space<vmem>>, vector<128x32xbf16>
    %cst_20 = arith.constant dense<0.000000e+00> : vector<8x32xf32>
    %42 = tpu.matmul %40, %41, %cst_20 {dimension_numbers = #tpu.dot_dimension_numbers<[1], [0], [0], [1], [0, 0, 1, 1], [], []>} : vector<8x128xbf16>, vector<128x32xbf16>, vector<8x32xf32> -> vector<8x32xf32>
    %c0_21 = arith.constant 0 : index
    %c0_22 = arith.constant 0 : index
    %43 = vector.load %arg10[%c0_21, %c0_22] : memref<1x32xf32, #tpu.memory_space<vmem>>, vector<1x32xf32>
    %44 = vector.broadcast %43 : vector<1x32xf32> to vector<8x32xf32>
    %45 = arith.addf %42, %44 : vector<8x32xf32>
    %c0_23 = arith.constant 0 : index
    %c0_24 = arith.constant 0 : index
    %46 = vector.load %arg2[%c0_23, %c0_24] : memref<8x1xf32, #tpu.memory_space<vmem>>, vector<8x1xf32>
    %47 = vector.broadcast %46 : vector<8x1xf32> to vector<8x32xf32>
    %48 = arith.mulf %45, %47 : vector<8x32xf32>
    %49 = tpu.iota {dimensions = array<i32: 0>} : vector<2x8xi32>
    %50 = tpu.iota {dimensions = array<i32: 1>} : vector<2x8xi32>
    %c4_i32 = arith.constant 4 : i32
    %51 = vector.broadcast %c4_i32 : i32 to vector<2x8xi32>
    %52 = arith.muli %49, %51 : vector<2x8xi32>
    %53 = arith.cmpi sge, %50, %52 : vector<2x8xi32>
    %c1_i32 = arith.constant 1 : i32
    %54 = vector.broadcast %c1_i32 : i32 to vector<2x8xi32>
    %55 = arith.addi %49, %54 : vector<2x8xi32>
    %c4_i32_25 = arith.constant 4 : i32
    %56 = vector.broadcast %c4_i32_25 : i32 to vector<2x8xi32>
    %57 = arith.muli %55, %56 : vector<2x8xi32>
    %58 = arith.cmpi slt, %50, %57 : vector<2x8xi32>
    %59 = arith.andi %53, %58 : vector<2x8xi1>
    %cst_26 = arith.constant 1.000000e+00 : f32
    %cst_27 = arith.constant 0.000000e+00 : f32
    %60 = vector.broadcast %cst_26 : f32 to vector<2x8xf32>
    %61 = vector.broadcast %cst_27 : f32 to vector<2x8xf32>
    %62 = arith.select %59, %60, %61 : vector<2x8xi1>, vector<2x8xf32>
    %cst_28 = arith.constant dense<0.000000e+00> : vector<2x32xf32>
    %63 = tpu.matmul %62, %48, %cst_28 {dimension_numbers = #tpu.dot_dimension_numbers<[1], [0], [0], [1], [0, 0, 1, 1], [], []>} : vector<2x8xf32>, vector<8x32xf32>, vector<2x32xf32> -> vector<2x32xf32>
    %c0_29 = arith.constant 0 : index
    %c0_30 = arith.constant 0 : index
    %64 = vector.load %arg11[%c0_29, %c0_30] : memref<2x32xf32, #tpu.memory_space<vmem>>, vector<2x32xf32>
    tpu.vector_store %arg11[%c0_29, %c0_30], %63 {strides = array<i32>} : memref<2x32xf32, #tpu.memory_space<vmem>>, vector<2x32xf32>,
    return
  }
  func.func @transform_0(%arg0: i32) -> (i32, i32) {
    %c0_i32 = arith.constant 0 : i32
    %c0_i32_0 = arith.constant 0 : i32
    return %arg0, %c0_i32 : i32, i32
  }
  func.func @transform_1(%arg0: i32) -> (i32, i32) {
    %c0_i32 = arith.constant 0 : i32
    %c0_i32_0 = arith.constant 0 : i32
    return %arg0, %c0_i32 : i32, i32
  }
  func.func @transform_2(%arg0: i32) -> (i32, i32) {
    %c0_i32 = arith.constant 0 : i32
    %c0_i32_0 = arith.constant 0 : i32
    %c0_i32_1 = arith.constant 0 : i32
    return %c0_i32, %c0_i32_0 : i32, i32
  }
  func.func @transform_3(%arg0: i32) -> (i32, i32) {
    %c0_i32 = arith.constant 0 : i32
    %c0_i32_0 = arith.constant 0 : i32
    %c0_i32_1 = arith.constant 0 : i32
    return %c0_i32, %c0_i32_0 : i32, i32
  }
  func.func @transform_4(%arg0: i32) -> (i32, i32) {
    %c0_i32 = arith.constant 0 : i32
    %c0_i32_0 = arith.constant 0 : i32
    %c0_i32_1 = arith.constant 0 : i32
    return %c0_i32, %c0_i32_0 : i32, i32
  }
  func.func @transform_5(%arg0: i32) -> (i32, i32) {
    %c0_i32 = arith.constant 0 : i32
    %c0_i32_0 = arith.constant 0 : i32
    %c0_i32_1 = arith.constant 0 : i32
    return %c0_i32, %c0_i32_0 : i32, i32
  }
  func.func @transform_6(%arg0: i32) -> (i32, i32) {
    %c0_i32 = arith.constant 0 : i32
    %c0_i32_0 = arith.constant 0 : i32
    %c0_i32_1 = arith.constant 0 : i32
    return %c0_i32, %c0_i32_0 : i32, i32
  }
  func.func @transform_7(%arg0: i32) -> (i32, i32) {
    %c0_i32 = arith.constant 0 : i32
    %c0_i32_0 = arith.constant 0 : i32
    %c0_i32_1 = arith.constant 0 : i32
    return %c0_i32, %c0_i32_0 : i32, i32
  }
  func.func @transform_8(%arg0: i32) -> (i32, i32) {
    %c0_i32 = arith.constant 0 : i32
    %c0_i32_0 = arith.constant 0 : i32
    %c0_i32_1 = arith.constant 0 : i32
    return %c0_i32, %c0_i32_0 : i32, i32
  }
  func.func @transform_9(%arg0: i32) -> (i32, i32) {
    %c0_i32 = arith.constant 0 : i32
    %c0_i32_0 = arith.constant 0 : i32
    %c0_i32_1 = arith.constant 0 : i32
    return %c0_i32, %c0_i32_0 : i32, i32
  }
  func.func @transform_10(%arg0: i32) -> (i32, i32) {
    %c0_i32 = arith.constant 0 : i32
    %c0_i32_0 = arith.constant 0 : i32
    return %arg0, %c0_i32 : i32, i32
  }
}

</mosaic_0001>

<bundles_post_ra>
// kernel: tpu_custom_call.1
= control target key start
LH: loop header
LB: loop body
LE: loop exit
PB: predicated region body
PF: predicated region fallthrough
CT: control target
= control target key end

     0   :  { %15 = vsyncpa [#allocation3], 0  ;;  %s1640_s0 = inlined_call_operand.hbm [shape: f32[8,64], index: 0, kind: input, shape index: {}]   ;;  %s1641_s1 = inlined_call_operand.vmem [shape: f32[8,1], index: 1, kind: input, shape index: {}]   ;;  %s1642_s2 = inlined_call_operand.vmem [shape: bf16[64,384], index: 2, kind: input, shape index: {}]   ;;  %s1643_s3 = inlined_call_operand.vmem [shape: f32[1,384], index: 3, kind: input, shape index: {}]   ;;  %s1644_s4 = inlined_call_operand.hbm [shape: bf16[384,256], index: 4, kind: input, shape index: {}]   ;;  %s1645_s5 = inlined_call_operand.hbm [shape: f32[1,256], index: 5, kind: input, shape index: {}]   ;;  %s1646_s6 = inlined_call_operand.hbm [shape: bf16[32,128], index: 6, kind: input, shape index: {}]   ;;  %s1647_s7 = inlined_call_operand.hbm [shape: f32[1,128], index: 7, kind: input, shape index: {}]   ;;  %s1648_s8 = inlined_call_operand.vmem [shape: bf16[128,32], index: 8, kind: input, shape index: {}]   ;;  %s1649_s9 = inlined_call_operand.vmem [shape: f32[1,32], index: 9, kind: input, shape index: {}]   ;;  %s1650_s10 = inlined_call_operand.hbm [shape: f32[2,32], index: 10, kind: output, shape index: {}]  }
   0x1   :  { %16 = vsyncpa [#allocation6], 0 }
   0x2   :  { %17 = vsyncpa [#allocation9], 0 }
   0x3   :  { %18 = vsyncpa [#allocation4], 0  ;;  %s1394_s13 = smov [#allocation5]   ;;  %s1254_s17 = scalar_lea.hbm %s1644_s4, 6144 }
   0x4   :  { %s40_s14 = sshll.u32 %s1394_s13, 4  ;;  %p1255_p0 = scmp.ne.s32.totalorder %s1644_s4, %s1254_s17  ;;  %s41_s14 = int_to_ptr.vmem [resolvable:$true] %s40_s14 }
   0x5   :  { %p1258_p1 = scmp.lt.u32.totalorder %s1254_s17, %s1644_s4 }
   0x7   :  { %p1260_p2 = pnand %p1258_p1, %p1255_p0 }
   0x9   :  { %1263 = shalt.err (!%p1260_p2)
}
   0xa   :  { %s1264_s22 = scalar_lea.vmem %s41_s14, 6144  ;;  %p1269_p4 = scmp.lt.s32.totalorder %s41_s14, %s41_s14 }
   0xb   :  { %p1265_p3 = scmp.ne.s32.totalorder %s41_s14, %s1264_s22  ;;  %p1270_p5 = scmp.lt.s32.totalorder %s1264_s22, %s1264_s22 }
   0xd   :  { %p1271_p6 = por %p1270_p5, %p1269_p4 }
   0xf   :  { %p1272_p7 = pnand %p1271_p6, %p1265_p3 }
  0x11   :  { %1275 = shalt.err (!%p1272_p7)
}
  0x12   :  { %s1395_s23 = smov 128   ;;  %s1396_s24 = smov 8  }
  0x13   :  { %46 = dma.hbm_to_vmem [thread:$0]  %s1644_s4, 6144, %s41_s14, [#allocation6], %s1395_s23, %s1395_s23, %s1396_s24  }
  0x14   :  { %s1397_s27 = smov [#allocation8]   ;;  %s1276_s11 = scalar_lea.hbm %s1646_s6, 256 }
  0x15   :  { %s62_s28 = sshll.u32 %s1397_s27, 4  ;;  %p1277_p8 = scmp.ne.s32.totalorder %s1646_s6, %s1276_s11  ;;  %s63_s28 = int_to_ptr.vmem [resolvable:$true] %s62_s28 }
  0x16   :  { %p1280_p9 = scmp.lt.u32.totalorder %s1276_s11, %s1646_s6 }
  0x18   :  { %p1282_p10 = pnand %p1280_p9, %p1277_p8 }
  0x1a   :  { %1285 = shalt.err (!%p1282_p10)
}
  0x1b   :  { %s1286_s17 = scalar_lea.vmem %s63_s28, 256  ;;  %p1291_p12 = scmp.lt.s32.totalorder %s63_s28, %s63_s28 }
  0x1c   :  { %p1287_p11 = scmp.ne.s32.totalorder %s63_s28, %s1286_s17  ;;  %p1292_p13 = scmp.lt.s32.totalorder %s1286_s17, %s1286_s17 }
  0x1e   :  { %p1293_p0 = por %p1292_p13, %p1291_p12 }
  0x20   :  { %p1294_p1 = pnand %p1293_p0, %p1287_p11 }
  0x22   :  { %1297 = shalt.err (!%p1294_p1)
}
  0x23   :  { %s1398_s4 = smov 64   ;;  %s1399_s14 = smov 4  }
  0x24   :  { %68 = dma.hbm_to_vmem [thread:$0]  %s1646_s6, 256, %s63_s28, [#allocation9], %s1398_s4, %s1398_s4, %s1399_s14  }
  0x25   :  { %s1400_s20 = smov [#allocation2]   ;;  %s1401_s22 = smov [#allocation7]  }
  0x26   :  { %s25_s21 = sshll.u32 %s1400_s20, 4  ;;  %s53_s23 = sshll.u32 %s1401_s22, 4  ;;  %s26_s21 = int_to_ptr.vmem [resolvable:$true] %s25_s21  ;;  %s54_s23 = int_to_ptr.vmem [resolvable:$true] %s53_s23 }
  0x27   :  { %s1298_s26 = scalar_lea.hbm %s1640_s0, 128 }
  0x28   :  { %p1299_p2 = scmp.ne.s32.totalorder %s1640_s0, %s1298_s26  ;;  %p1302_p3 = scmp.lt.u32.totalorder %s1298_s26, %s1640_s0 }
  0x2a   :  { %p1304_p4 = pnand %p1302_p3, %p1299_p2 }
  0x2c   :  { %1307 = shalt.err (!%p1304_p4)
}
  0x2d   :  { %s1308_s6 = scalar_lea.vmem %s26_s21, 128  ;;  %p1313_p6 = scmp.lt.s32.totalorder %s26_s21, %s26_s21 }
  0x2e   :  { %p1309_p5 = scmp.ne.s32.totalorder %s26_s21, %s1308_s6  ;;  %p1314_p7 = scmp.lt.s32.totalorder %s1308_s6, %s1308_s6 }
  0x30   :  { %p1315_p8 = por %p1314_p7, %p1313_p6 }
  0x32   :  { %p1316_p9 = pnand %p1315_p8, %p1309_p5 }
  0x34   :  { %1319 = shalt.err (!%p1316_p9)
}
  0x35   :  { %28 = dma.hbm_to_vmem [thread:$0]  %s1640_s0, 128, %s26_s21, [#allocation3]  }
  0x36   :  { %s1320_s16 = scalar_lea.hbm %s1645_s5, 32 }
  0x37   :  { %p1321_p10 = scmp.ne.s32.totalorder %s1645_s5, %s1320_s16  ;;  %p1324_p11 = scmp.lt.u32.totalorder %s1320_s16, %s1645_s5 }
  0x39   :  { %p1326_p12 = pnand %p1324_p11, %p1321_p10 }
  0x3b   :  { %1329 = shalt.err (!%p1326_p12)
}
  0x3c   :  { %s1330_s20 = scalar_lea.vmem %s54_s23, 32  ;;  %p1335_p0 = scmp.lt.s32.totalorder %s54_s23, %s54_s23 }
  0x3d   :  { %p1331_p13 = scmp.ne.s32.totalorder %s54_s23, %s1330_s20  ;;  %p1336_p1 = scmp.lt.s32.totalorder %s1330_s20, %s1330_s20 }
  0x3f   :  { %p1337_p2 = por %p1336_p1, %p1335_p0 }
  0x41   :  { %p1338_p3 = pnand %p1337_p2, %p1331_p13 }
  0x43   :  { %1341 = shalt.err (!%p1338_p3)
}
  0x44   :  { %56 = dma.hbm_to_vmem [thread:$0]  %s1645_s5, 32, %s54_s23, [#allocation6]  }
  0x45   :  { %s1402_s22 = smov [#allocation10]   ;;  %s1342_s27 = scalar_lea.hbm %s1647_s7, 16 }
  0x46   :  { %s75_s24 = sshll.u32 %s1402_s22, 4  ;;  %p1343_p4 = scmp.ne.s32.totalorder %s1647_s7, %s1342_s27  ;;  %s76_s24 = int_to_ptr.vmem [resolvable:$true] %s75_s24 }
  0x47   :  { %p1346_p5 = scmp.lt.u32.totalorder %s1342_s27, %s1647_s7 }
  0x49   :  { %p1348_p6 = pnand %p1346_p5, %p1343_p4 }
  0x4b   :  { %1351 = shalt.err (!%p1348_p6)
}
  0x4c   :  { %s1352_s28 = scalar_lea.vmem %s76_s24, 16  ;;  %s1356_s5 = scalar_lea.vmem %s76_s24, 32 }
  0x4d   :  { %p1353_p7 = scmp.ne.s32.totalorder %s76_s24, %s1352_s28  ;;  %p1357_p8 = scmp.lt.s32.totalorder %s76_s24, %s76_s24 }
  0x4e   :  { %p1358_p9 = scmp.lt.s32.totalorder %s1356_s5, %s1352_s28 }
  0x50   :  { %p1359_p10 = por %p1358_p9, %p1357_p8 }
  0x52   :  { %p1360_p11 = pnand %p1359_p10, %p1353_p7 }
  0x54   :  { %1363 = shalt.err (!%p1360_p11)
}
  0x55   :  { %78 = dma.hbm_to_vmem [thread:$0]  %s1647_s7, 16, %s76_s24, [#allocation9]  }
  0x56   :  { %1386 = dma.done.wait [#allocation3], 128  }
  0x57   :  { %1387 = vsyncadd [#allocation3], 4294967168 }
  0x58   :  { %1388 = dma.done.wait [#allocation6], 6176  }
  0x59   :  { %1389 = vsyncadd [#allocation6], 4294961120 }
  0x5a   :  { %1390 = dma.done.wait [#allocation9], 272  }
  0x5b   :  { %1391 = vsyncadd [#allocation9], 4294967024  ;;  %v1403_v0 = vmov 0.0   ;;  %v1404_v1 = vmov 0   ;;  %vm1405_vm0 = vmmov 0   ;;  %v99_v14 = vld [vmem:[#allocation2] sm:$0xff] }
  0x5c   :  { %1081 = vmatprep.subr.bf16.mxu1 %v1403_v0  ;;  %234 = vmatprep.mubr.bf16.mxu0 %v1404_v1  ;;  %v1156_v2 = vld [vmem:[%s1642_s2 + $0x4] ss:$12 sps:$4 sm:$0xff]   ;;  %v1158_v3 = vld [vmem:[%s1642_s2] ss:$12 sps:$4 sm:$0xff]   ;;  %v1159_v4 = vld [vmem:[%s1642_s2 + $0x8] ss:$12 sps:$4 sm:$0xff]   ;;  %v100_v16 = vpack.c.bf16 %v99_v14, %v99_v14 }
  0x5d   :  { %1089 = vmatprep.mubr.msk.bf16.mxu1 %vm1405_vm0, %v1403_v0  ;;  %1154 = vset.pattern.permute.xlu1 %v1404_v1  ;;  %v1160_v5 = vld [vmem:[%s1642_s2 + $0x1c] ss:$12 sps:$4 sm:$0xff]   ;;  %v1162_v6 = vld [vmem:[%s1642_s2 + $0x18] ss:$12 sps:$4 sm:$0xff]   ;;  %v1163_v7 = vld [vmem:[%s1642_s2 + $0x20] ss:$12 sps:$4 sm:$0xff]  }
  0x5e   :  { %1155 = vset.pattern.permute.xlu0 %v1404_v1  ;;  %202 = vmatprep.subr.bf16.mxu0 %v1156_v2  ;;  %v1164_v8 = vld [vmem:[%s1642_s2 + $0x34] ss:$12 sps:$4 sm:$0xff]   ;;  %v1166_v9 = vld [vmem:[%s1642_s2 + $0x30] ss:$12 sps:$4 sm:$0xff]   ;;  %v1167_v10 = vld [vmem:[%s1642_s2 + $0x38] ss:$12 sps:$4 sm:$0xff]  }
  0x5f   :  { %203 = vmatpush1.bf16.msra.mxu0 %v1158_v3  ;;  %1082 = vmatpush3.bf16.msra.mxu1 %v1159_v4  ;;  %v1168_v11 = vld [vmem:[%s1642_s2 + $0x4c] ss:$12 sps:$4 sm:$0xff]   ;;  %v1170_v12 = vld [vmem:[%s1642_s2 + $0x48] ss:$12 sps:$4 sm:$0xff]   ;;  %v1171_v13 = vld [vmem:[%s1642_s2 + $0x50] ss:$12 sps:$4 sm:$0xff]  }
  0x60   :  { %204 = vmatprep.subr.bf16.mxu0 %v1160_v5  ;;  %1083 = vmatprep.subr.bf16.mxu1 %v1403_v0  ;;  %v1174_v15 = vld [vmem:[#allocation5 + $0x4] ss:$8 sps:$4 sm:$0xff]   ;;  %vm198_vm1 = vcmask 523264   ;;  %v1172_v17 = vld [vmem:[#allocation5] ss:$8 sps:$4 sm:$0xff]   ;;  %vm718_vm2 = vcmask 261120  }
  0x61   :  { %v1177_v18 = vld [vmem:[#allocation5 + $0x14] ss:$8 sps:$4 sm:$0xff]   ;;  %v1175_v19 = vld [vmem:[#allocation5 + $0x10] ss:$8 sps:$4 sm:$0xff]   ;;  %v1180_v20 = vld [vmem:[#allocation5 + $0x24] ss:$8 sps:$4 sm:$0xff]  }
  0x62   :  { %v1196_v21 = vld [vmem:[#allocation5 + $0x100] ss:$8 sps:$4 sm:$0xff]   ;;  %v1198_v22 = vld [vmem:[#allocation5 + $0x104] ss:$8 sps:$4 sm:$0xff]   ;;  %v1183_v24 = vld [vmem:[#allocation5 + $0x34] ss:$8 sps:$4 sm:$0xff]  }
  0x63   :  { %205 = vmatpush1.bf16.msra.mxu0 %v1162_v6  ;;  %1084 = vmatpush3.bf16.msra.mxu1 %v1163_v7  ;;  %v1178_v23 = vld [vmem:[#allocation5 + $0x20] ss:$8 sps:$4 sm:$0xff]   ;;  %v1202_v25 = vld [vmem:[#allocation5 + $0x110] ss:$8 sps:$4 sm:$0xff]   ;;  %v1204_v26 = vld [vmem:[#allocation5 + $0x114] ss:$8 sps:$4 sm:$0xff]  }
  0x64   :  { %206 = vmatprep.subr.bf16.mxu0 %v1164_v8  ;;  %1085 = vmatprep.subr.bf16.mxu1 %v1403_v0  ;;  %v1181_v27 = vld [vmem:[#allocation5 + $0x30] ss:$8 sps:$4 sm:$0xff]   ;;  %v1210_v28 = vld [vmem:[#allocation5 + $0x124] ss:$8 sps:$4 sm:$0xff]   ;;  %v1208_v30 = vld [vmem:[#allocation5 + $0x120] ss:$8 sps:$4 sm:$0xff]  }
  0x65   :  { %v1186_v29 = vld [vmem:[#allocation5 + $0x44] ss:$8 sps:$4 sm:$0xff]   ;;  %v1216_v31 = vld [vmem:[#allocation5 + $0x134] ss:$8 sps:$4 sm:$0xff]   ;;  %v1184_v32 = vld [vmem:[#allocation5 + $0x40] ss:$8 sps:$4 sm:$0xff]  }
  0x66   :  { %v1189_v33 = vld [vmem:[#allocation5 + $0x54] ss:$8 sps:$4 sm:$0xff]   ;;  %v1214_v34 = vld [vmem:[#allocation5 + $0x130] ss:$8 sps:$4 sm:$0xff]   ;;  %v1222_v35 = vld [vmem:[#allocation5 + $0x144] ss:$8 sps:$4 sm:$0xff]  }
  0x67   :  { %207 = vmatpush1.bf16.msra.mxu0 %v1166_v9  ;;  %1086 = vmatpush3.bf16.msra.mxu1 %v1167_v10  ;;  %v1187_v36 = vld [vmem:[#allocation5 + $0x50] ss:$8 sps:$4 sm:$0xff]   ;;  %v1192_v37 = vld [vmem:[#allocation5 + $0x64] ss:$8 sps:$4 sm:$0xff]   ;;  %v1220_v38 = vld [vmem:[#allocation5 + $0x140] ss:$8 sps:$4 sm:$0xff]  }
  0x68   :  { %208 = vmatprep.subr.bf16.mxu0 %v1168_v11  ;;  %1087 = vmatprep.subr.bf16.mxu1 %v1403_v0  ;;  %v1228_v39 = vld [vmem:[#allocation5 + $0x154] ss:$8 sps:$4 sm:$0xff]   ;;  %v1190_v40 = vld [vmem:[#allocation5 + $0x60] ss:$8 sps:$4 sm:$0xff]   ;;  %v1226_v42 = vld [vmem:[#allocation5 + $0x150] ss:$8 sps:$4 sm:$0xff]  }
  0x69   :  { %v1195_v41 = vld [vmem:[#allocation5 + $0x74] ss:$8 sps:$4 sm:$0xff]   ;;  %v1193_v43 = vld [vmem:[#allocation5 + $0x70] ss:$8 sps:$4 sm:$0xff]   ;;  %v1201_v44 = vld [vmem:[#allocation5 + $0x84] ss:$8 sps:$4 sm:$0xff]  }
  0x6a   :  { %v1199_v45 = vld [vmem:[#allocation5 + $0x80] ss:$8 sps:$4 sm:$0xff]   ;;  %v1207_v46 = vld [vmem:[#allocation5 + $0x94] ss:$8 sps:$4 sm:$0xff]   ;;  %v1205_v47 = vld [vmem:[#allocation5 + $0x90] ss:$8 sps:$4 sm:$0xff]  }
  0x6b   :  { %209 = vmatpush1.bf16.msra.mxu0 %v1170_v12  ;;  %1088 = vmatpush3.bf16.msra.mxu1 %v1171_v13  ;;  %v1213_v48 = vld [vmem:[#allocation5 + $0xa4] ss:$8 sps:$4 sm:$0xff]   ;;  %v1211_v49 = vld [vmem:[#allocation5 + $0xa0] ss:$8 sps:$4 sm:$0xff]   ;;  %v1219_v50 = vld [vmem:[#allocation5 + $0xb4] ss:$8 sps:$4 sm:$0xff]  }
  0x6c   :  { %589 = vmatprep.subr.bf16.mxu0 %v1174_v15  ;;  %630 = vmatprep.subr.bf16.mxu1 %v1198_v22  ;;  %v1217_v51 = vld [vmem:[#allocation5 + $0xb0] ss:$8 sps:$4 sm:$0xff]   ;;  %v1225_v52 = vld [vmem:[#allocation5 + $0xc4] ss:$8 sps:$4 sm:$0xff]   ;;  %v1223_v53 = vld [vmem:[#allocation5 + $0xc0] ss:$8 sps:$4 sm:$0xff]  }
  0x6d   :  { %v1231_v54 = vld [vmem:[#allocation5 + $0xd4] ss:$8 sps:$4 sm:$0xff]   ;;  %v1229_v55 = vld [vmem:[#allocation5 + $0xd0] ss:$8 sps:$4 sm:$0xff]   ;;  %v1234_v56 = vld [vmem:[#allocation5 + $0x164] ss:$8 sps:$4 sm:$0xff]  }
  0x6e   :  { %998 = vmatmul.mubr.msk.bf16.vlgmr.msra.gmra.mrb[0].mxu0 %vm198_vm1, %v100_v16  ;;  %1090 = vmatmul.mubr.msk.bf16.vlgmr.msra.gmra.mrb[0].mxu1 %vm198_vm1, %v100_v16  ;;  %v1232_v57 = vld [vmem:[#allocation5 + $0x160] ss:$8 sps:$4 sm:$0xff]   ;;  %v1237_v58 = vld [vmem:[#allocation5 + $0xe4] ss:$8 sps:$4 sm:$0xff]   ;;  %v1240_v60 = vld [vmem:[#allocation5 + $0x174] ss:$8 sps:$4 sm:$0xff]  }
  0x6f   :  { %590 = vmatpush1.bf16.msra.mxu0 %v1172_v17  ;;  %662 = vmatprep.mubr.bf16.mxu1 %v1404_v1  ;;  %v1235_v59 = vld [vmem:[#allocation5 + $0xe0] ss:$8 sps:$4 sm:$0xff]   ;;  %v1238_v61 = vld [vmem:[#allocation5 + $0x170] ss:$8 sps:$4 sm:$0xff]   ;;  %v1243_v62 = vld [vmem:[#allocation5 + $0xf4] ss:$8 sps:$4 sm:$0xff]   ;;  %v119_v1 = vlaneseq }
  0x70   :  { %591 = vmatprep.subr.bf16.mxu0 %v1177_v18  ;;  %631 = vmatpush1.bf16.msra.mxu1 %v1196_v21  ;;  %v1241_v63 = vld [vmem:[#allocation5 + $0xf0] ss:$8 sps:$4 sm:$0xff]   ;;  %vm893_vm6 = vcmask 64512   ;;  %s1407_s11 = smov [#allocation11]   ;;  %vm967_vm7 = vcmask 254976  }
  0x71   :  { %632 = vmatprep.subr.bf16.mxu1 %v1204_v26  ;;  %v1570_v2 = vshrl.u32 %v119_v1, 7  ;;  %v117_v4 = vld [vmem:[%s1643_s3] sm:$0x7]  ;;  %s1406_s3 = smov 96   ;;  %s975_s6 = sshll.u32 %s1407_s11, 4  ;;  %s976_s6 = int_to_ptr.vmem [resolvable:$true] %s975_s6 }
  0x72   :  { %p1369_p13 = scmp.lt.s32.totalorder %s976_s6, %s976_s6 }
  0x73   :  { %592 = vmatpush1.bf16.msra.mxu0 %v1175_v19  ;;  %v121_v3 = vsub.s32 0, %v1570_v2  ;;  %v125_v5 = vsub.s32 1, %v1570_v2  ;;  %v129_v6 = vsub.s32 2, %v1570_v2 }
  0x74   :  { %593 = vmatprep.subr.bf16.mxu0 %v1180_v20  ;;  %633 = vmatpush1.bf16.msra.mxu1 %v1202_v25 }
  0x75   :  { %634 = vmatprep.subr.bf16.mxu1 %v1210_v28  ;;  %v122_v7 = vrot.slane %v117_v4, %v121_v3  ;;  %v126_v8 = vrot.slane %v117_v4, %v125_v5  ;;  %v130_v9 = vrot.slane %v117_v4, %v129_v6  ;;  %v1253_v6 = vld [vmem:[%s1648_s8 + $0x38] sm:$0xff]  }
  0x77   :  { %594 = vmatpush1.bf16.msra.mxu0 %v1178_v23 }
  0x78   :  { %595 = vmatprep.subr.bf16.mxu0 %v1183_v24  ;;  %635 = vmatpush1.bf16.msra.mxu1 %v1208_v30 }
  0x79   :  { %636 = vmatprep.subr.bf16.mxu1 %v1216_v31 }
  0x7b   :  { %596 = vmatpush1.bf16.msra.mxu0 %v1181_v27  ;;  %v337_v27 = vld [vmem:[#allocation7] sm:$0x3] }
  0x7c   :  { %597 = vmatprep.subr.bf16.mxu0 %v1186_v29  ;;  %637 = vmatpush1.bf16.msra.mxu1 %v1214_v34  ;;  %v342_v28 = vrot.slane %v337_v27, %v121_v3  ;;  %v346_v29 = vrot.slane %v337_v27, %v125_v5  ;;  %v1252_v5 = vld [vmem:[%s1648_s8 + $0x30] sm:$0xff]  }
  0x7d   :  { %638 = vmatprep.subr.bf16.mxu1 %v1222_v35 }
  0x7f   :  { %598 = vmatpush1.bf16.msra.mxu0 %v1184_v32 }
  0x80   :  { %599 = vmatprep.subr.bf16.mxu0 %v1189_v33  ;;  %639 = vmatpush1.bf16.msra.mxu1 %v1220_v38 }
  0x81   :  { %640 = vmatprep.subr.bf16.mxu1 %v1228_v39 }
  0x83   :  { %600 = vmatpush1.bf16.msra.mxu0 %v1187_v36 }
  0x84   :  { %601 = vmatprep.subr.bf16.mxu0 %v1192_v37  ;;  %641 = vmatpush1.bf16.msra.mxu1 %v1226_v42 }
  0x85   :  { %642 = vmatprep.subr.bf16.mxu1 %v1234_v56  ;;  %v1249_v56 = vld [vmem:[%s1648_s8 + $0x18] sm:$0xff]  }
  0x87   :  { %602 = vmatpush1.bf16.msra.mxu0 %v1190_v40 }
  0x88   :  { %603 = vmatprep.subr.bf16.mxu0 %v1195_v41  ;;  %643 = vmatpush1.bf16.msra.mxu1 %v1232_v57  ;;  %v1250_v57 = vld [vmem:[%s1648_s8 + $0x20] sm:$0xff]  }
  0x89   :  { %644 = vmatprep.subr.bf16.mxu1 %v1240_v60 }
  0x8b   :  { %604 = vmatpush1.bf16.msra.mxu0 %v1193_v43 }
  0x8c   :  { %605 = vmatprep.subr.bf16.mxu0 %v1201_v44  ;;  %645 = vmatpush1.bf16.msra.mxu1 %v1238_v61 }
  0x8d   :  { %1101 = vmatprep.subr.bf16.mxu1 %v1403_v0 }
  0x8f   :  { %606 = vmatpush1.bf16.msra.mxu0 %v1199_v45  ;;  %v1244_v45 = vld [vmem:[#allocation8] sm:$0xff]  }
  0x90   :  { %607 = vmatprep.subr.bf16.mxu0 %v1207_v46  ;;  %v1245_v46 = vld [vmem:[#allocation8 + $0x8] sm:$0xff]  }
  0x93   :  { %608 = vmatpush1.bf16.msra.mxu0 %v1205_v47 }
  0x94   :  { %609 = vmatprep.subr.bf16.mxu0 %v1213_v48 }
  0x97   :  { %610 = vmatpush1.bf16.msra.mxu0 %v1211_v49 }
  0x98   :  { %611 = vmatprep.subr.bf16.mxu0 %v1219_v50  ;;  %v1246_v50 = vld [vmem:[%s1648_s8] sm:$0xff]  }
  0x9b   :  { %612 = vmatpush1.bf16.msra.mxu0 %v1217_v51 }
  0x9c   :  { %613 = vmatprep.subr.bf16.mxu0 %v1225_v52 }
  0x9f   :  { %614 = vmatpush1.bf16.msra.mxu0 %v1223_v53  ;;  %v1247_v53 = vld [vmem:[%s1648_s8 + $0x8] sm:$0xff]  }
  0xa0   :  { %615 = vmatprep.subr.bf16.mxu0 %v1231_v54 }
  0xa3   :  { %616 = vmatpush1.bf16.msra.mxu0 %v1229_v55  ;;  %v1248_v55 = vld [vmem:[%s1648_s8 + $0x10] sm:$0xff]  }
  0xa4   :  { %617 = vmatprep.subr.bf16.mxu0 %v1237_v58  ;;  %v1251_v58 = vld [vmem:[%s1648_s8 + $0x28] sm:$0xff]  }
  0xa7   :  { %618 = vmatpush1.bf16.msra.mxu0 %v1235_v59 }
  0xa8   :  { %619 = vmatprep.subr.bf16.mxu0 %v1243_v62 }
  0xab   :  { %620 = vmatpush1.bf16.msra.mxu0 %v1241_v63 }
  0xac   :  { %1093 = vmatprep.subr.bf16.mxu0 %v1403_v0 }
 0x141   :  { %v236_v10 = vpop.f32.mrb[0].mxu0  ;;  %v277_v13 = vpop.f32.mrb[0].mxu1 }
 0x142   :  { %v237_v11 = vadd.f32 %v236_v10, %v122_v7  ;;  %v238_v12 = vpop.f32.mrb[1].mxu0  ;;  %v278_v15 = vadd.f32 %v277_v13, %v130_v9  ;;  %v1091_v17 = vpop.f32.mrb[1].mxu1  ;;  %v875_v7 = vld [vmem:[%s1641_s1] sm:$0xff] }
 0x143   :  { %v239_v14 = vadd.f32 %v238_v12, %v126_v8  ;;  %v240_v16 = vpop.f32.mrb[2].mxu0  ;;  %v280_v20 = vpop.f32.mrb[2].mxu1  ;;  %878 = vperm.xlu1 %1154, %v875_v7   ;;  %v1048_v8 = vld [vmem:[#allocation10] ss:$0 sm:$0xff]  ;;  %v885_v17 = vand.u32 127, %v119_v1 }
 0x144   :  { %v283_v18 = vmax.f32 %v237_v11, 0.0  ;;  %v241_v19 = vpop.f32.mrb[3].mxu0  ;;  %v285_v22 = vmax.f32 %v278_v15, 0.0  ;;  %v1092_v23 = vpop.f32.mrb[3].mxu1  ;;  %v888_v16 = vadd.s32 1, %v1570_v2 }
 0x145   :  { %v284_v21 = vmax.f32 %v239_v14, 0.0  ;;  %v1052_v20 = vld [vmem:[%s1649_s9] ss:$0 sm:$0xff]  ;;  %s1364_s9 = scalar_lea.vmem %s976_s6, 32 }
 0x146   :  { %v288_v25 = vpack.c.bf16 %v285_v22, %v285_v22  ;;  %v286_v26 = vpack.c.bf16 %v283_v18, %v283_v18  ;;  %v886_v18 = vmul.u32 4, %v1570_v2  ;;  %v889_v19 = vmul.u32 4, %v888_v16  ;;  %p1365_p12 = scmp.ne.s32.totalorder %s976_s6, %s1364_s9  ;;  %p1370_p0 = scmp.lt.s32.totalorder %s1364_s9, %s1364_s9 }
 0x147   :  { %v287_v24 = vpack.c.bf16 %v284_v21, %v284_v21 }
 0x148   :  { %663 = vmatmul.mubr.bf16.vlgmr.msra.gmra.mrb[4].mxu1 %v288_v25  ;;  %vm887_vm3 = vcmp.ge.s32.totalorder %v885_v17, %v886_v18  ;;  %vm890_vm4 = vcmp.lt.s32.totalorder %v885_v17, %v889_v19  ;;  %p1371_p1 = por %p1370_p0, %p1369_p13 }
 0x149   :  { %621 = vmatprep.mubr.bf16.mxu0 %v287_v24  ;;  %1117 = vmatprep.mubr.msk.bf16.mxu1 %vm1405_vm0, %v1403_v0  ;;  %vm891_vm5 = vmand %vm887_vm3, %vm890_vm4 }
 0x14a   :  { %622 = vmatmul.mubr.bf16.vlgmr.msra.gmra.mrb[4].mxu0 %v286_v26  ;;  %1102 = vmatpush3.bf16.msra.mxu1 %v1246_v50  ;;  %p1372_p2 = pnand %p1371_p1, %p1365_p12 }
 0x14b   :  { %1097 = vmatprep.mubr.msk.bf16.mxu0 %vm1405_vm0, %v1403_v0  ;;  %1094 = vmatpush3.bf16.msra.mxu0 %v1244_v45 }
 0x14c   :  { %1095 = vmatprep.subr.bf16.mxu0 %v1403_v0  ;;  %1103 = vmatprep.subr.bf16.mxu1 %v1403_v0 }
 0x14e   :  { %1104 = vmatpush3.bf16.msra.mxu1 %v1247_v53 }
 0x14f   :  { %1096 = vmatpush3.bf16.msra.mxu0 %v1245_v46  ;;  %1105 = vmatprep.subr.bf16.mxu1 %v1403_v0 }
 0x152   :  { %1106 = vmatpush3.bf16.msra.mxu1 %v1248_v55 }
 0x153   :  { %1107 = vmatprep.subr.bf16.mxu1 %v1403_v0 }
 0x156   :  { %1108 = vmatpush3.bf16.msra.mxu1 %v1249_v56 }
 0x157   :  { %1109 = vmatprep.subr.bf16.mxu1 %v1403_v0 }
 0x15a   :  { %1110 = vmatpush3.bf16.msra.mxu1 %v1250_v57 }
 0x15b   :  { %1111 = vmatprep.subr.bf16.mxu1 %v1403_v0 }
 0x15e   :  { %1112 = vmatpush3.bf16.msra.mxu1 %v1251_v58 }
 0x15f   :  { %1113 = vmatprep.subr.bf16.mxu1 %v1403_v0 }
 0x162   :  { %1114 = vmatpush3.bf16.msra.mxu1 %v1252_v5 }
 0x163   :  { %1115 = vmatprep.subr.bf16.mxu1 %v1403_v0 }
 0x166   :  { %1116 = vmatpush3.bf16.msra.mxu1 %v1253_v6 }
 0x167   :  { %1121 = vmatprep.subr.mxu1 %v1403_v0 }
 0x1c2   :  { %v879_v22 = vpop.permute.xlu1 %878 }
 0x21b   :  { %v664_v30 = vpop.f32.mrb[4].mxu1 }
 0x21c   :  { %v666_v32 = vpop.f32.mrb[5].mxu1 }
 0x21d   :  { %v623_v31 = vpop.f32.mrb[4].mxu0  ;;  %v668_v35 = vpop.f32.mrb[6].mxu1 }
 0x21e   :  { %v624_v33 = vadd.f32 %v623_v31, %v342_v28  ;;  %v625_v34 = vpop.f32.mrb[5].mxu0  ;;  %v669_v38 = vpop.f32.mrb[7].mxu1  ;;  %v892_v28 = vsel %vm891_vm5, 1.0, %v1403_v0 }
 0x21f   :  { %v626_v36 = vadd.f32 %v625_v34, %v346_v29  ;;  %v627_v37 = vpop.f32.mrb[6].mxu0 }
 0x220   :  { %v665_v39 = vadd.f32 %v664_v30, %v624_v33  ;;  %v628_v40 = vpop.f32.mrb[7].mxu0 }
 0x221   :  { %v667_v41 = vadd.f32 %v666_v32, %v626_v36 }
 0x222   :  { %v671_v42 = vmax.f32 %v665_v39, 0.0 }
 0x223   :  { %v672_v43 = vmax.f32 %v667_v41, 0.0 }
 0x225   :  { %v1144_v44 = vpack.i.bf16 %v672_v43, %v671_v42 }
 0x227   :  { %1145 = vrot.lane.b32.xlu0 %v1144_v44, %s1406_s3 }
 0x299   :  { %v1146_v47 = vpop.permute.xlu0 %1145 }
 0x29a   :  { %v1148_v48 = vunpack.i.h.bf16 %v1146_v47  ;;  %v1147_v49 = vunpack.i.l.bf16 %v1146_v47 }
 0x29c   :  { %v677_v51 = vmax.f32 %v671_v42, %v1147_v49  ;;  %v682_v52 = vmax.f32 %v672_v43, %v1148_v48 }
 0x29e   :  { %v1149_v54 = vpack.i.bf16 %v682_v52, %v677_v51 }
 0x2a0   :  { %1150 = vrot.lane.b32.xlu0 %v1149_v54, %s1398_s4 }
 0x312   :  { %v1151_v59 = vpop.permute.xlu0 %1150 }
 0x313   :  { %v1153_v60 = vunpack.i.h.bf16 %v1151_v59  ;;  %v1152_v61 = vunpack.i.l.bf16 %v1151_v59 }
 0x315   :  { %v692_v62 = vmax.f32 %v682_v52, %v1153_v60  ;;  %v687_v63 = vmax.f32 %v677_v51, %v1152_v61 }
 0x317   :  { %v693_v3 = vmax.f32 %v687_v63, %v692_v62 }
 0x319   :  { %v694_v4 = vpack.c.bf16 %v693_v3, %v693_v3 }
 0x31b   :  { %1098 = vmatmul.mubr.msk.bf16.vlgmr.msra.gmra.mrb[8].mxu0 %vm718_vm2, %v694_v4 }
 0x3ee   :  { %v756_v9 = vpop.f32.mrb[8].mxu0 }
 0x3ef   :  { %v757_v10 = vadd.f32 %v1048_v8, %v756_v9  ;;  %v1099_v11 = vpop.f32.mrb[9].mxu0 }
 0x3f0   :  { %v759_v12 = vpop.f32.mrb[10].mxu0 }
 0x3f1   :  { %v762_v13 = vmax.f32 %v757_v10, 0.0  ;;  %v1100_v14 = vpop.f32.mrb[11].mxu0 }
 0x3f3   :  { %v763_v15 = vpack.c.bf16 %v762_v13, %v762_v13 }
 0x3f5   :  { %1118 = vmatmul.mubr.bf16.vlgmr.msra.gmra.mrb[8].mxu1 %v763_v15 }
 0x3f6   :  { %1123 = vmatprep.mubr.msk.f32.mxu1 %vm1405_vm0, %v1403_v0 }
 0x4c8   :  { %v869_v21 = vpop.f32.mrb[8].mxu1 }
 0x4c9   :  { %v870_v23 = vadd.f32 %v1052_v20, %v869_v21  ;;  %v1119_v24 = vpop.f32.mrb[9].mxu1 }
 0x4ca   :  { %v872_v25 = vpop.f32.mrb[10].mxu1 }
 0x4cb   :  { %v881_v26 = vmul.f32 %v879_v22, %v870_v23  ;;  %v1120_v27 = vpop.f32.mrb[11].mxu1 }
 0x4cd   :  { %1122 = vmatpush3.msra.mxu1 %v881_v26 }
 0x4ce   :  { %1124 = vmatmul.mubr.msk.f32.vlgmr.msra.gmra.mrb[12].mxu1 %vm893_vm6, %v892_v28 }
 0x5a1   :  { %v963_v1 = vpop.f32.mrb[12].mxu1 }
 0x5a2   :  { %v1125_v2 = vpop.f32.mrb[13].mxu1  ;;  %968 = vst.msk [vmem:[#allocation11] sm:$0x3] %vm967_vm7, %v963_v1 }
 0x5a3   :  { %1375 = shalt.err (!%p1372_p2)
}
 0x5a4   :  { %s1376_s23 = scalar_lea.hbm %s1650_s10, 32 }
 0x5a5   :  { %p1377_p3 = scmp.ne.s32.totalorder %s1650_s10, %s1376_s23  ;;  %p1380_p4 = scmp.lt.u32.totalorder %s1376_s23, %s1650_s10 }
 0x5a7   :  { %p1382_p5 = pnand %p1380_p4, %p1377_p3 }
 0x5a9   :  { %1385 = shalt.err (!%p1382_p5)
}
 0x5aa   :  { %978 = dma.vmem_to_hbm [thread:$0]  %s976_s6, 32, %s1650_s10, [#allocation4]  }
 0x5ab   :  { %1392 = dma.done.wait [#allocation4], 32  }
 0x5ac   :  { %1393 = vsyncadd [#allocation4], 4294967264 }
 0x5ad   :  { %982 = vsyncpa [#allocation3], 1 }
 0x5ae   :  { %983 = vsyncpa [#allocation6], 1 }
 0x5af   :  { %984 = vsyncpa [#allocation9], 1 }
 0x5b0   :  { %985 = vsyncpa [#allocation4], 1 }

</bundles_post_ra>
